<compile_context>
chip_gen: v5e
topology: v5e:2x2
jax: 0.10.0
libtpu: 0.0.40
codegen_flags: <defaults>
</compile_context>

<pallas_src>
import functools

import jax
import jax.numpy as jnp
import numpy as np
from jax.experimental import pallas as pl
from jax.experimental.pallas import tpu as pltpu


def _round_up(v, m):
    return ((v + m - 1) // m) * m


def _padded_vmem_bytes(arr):
    """VMEM footprint of one buffered copy of `arr` after (8, 128) tiling."""
    if arr.ndim >= 2:
        r, c = arr.shape[-2], arr.shape[-1]
        lead = int(np.prod(arr.shape[:-2], dtype=np.int64)) if arr.ndim > 2 else 1
    else:
        r, c = 1, arr.shape[-1]
        lead = 1
    return lead * _round_up(r, 8) * _round_up(c, 128) * jnp.dtype(arr.dtype).itemsize


def _vmem_budget_bytes():
    """Generation-aware scoped-VMEM cap, leaving headroom for Mosaic scratch."""
    try:
        cap = int(pltpu.get_tpu_info().vmem_capacity_bytes)
    except Exception:
        cap = 64 << 20  # conservative fallback: v7x per-TensorCore VMEM
    # ~48 MiB on v7x (64 MiB physical), ~112 MiB on v5e/v6e (128 MiB physical).
    return max(cap - (16 << 20), cap // 2, 32 << 20)


# --------------------------- kernels --------------------------------------- #


def _ca_single_pass_kernel(x_ref, w1_ref, w2_ref, o_ref):
    """Resident slab: pool + MLP gate + scale in one pass over x."""
    x = x_ref[0]                                                     # (C, HW)

    avg = jnp.mean(x, axis=-1, keepdims=True, dtype=jnp.float32)     # (C, 1)
    mx = jnp.max(x, axis=-1, keepdims=True).astype(jnp.float32)      # (C, 1)
    pooled = jnp.concatenate([avg, mx], axis=-1)                     # (C, 2)

    w1 = w1_ref[...].astype(jnp.float32)                             # (Cr, C)
    w2 = w2_ref[...].astype(jnp.float32)                             # (C, Cr)

    # Both branches through fc1 + ReLU as one tiny matmul (columns = avg/max).
    h = jnp.maximum(
        jnp.dot(w1, pooled, preferred_element_type=jnp.float32), 0.0)   # (Cr, 2)
    # fc2 is linear and bias-free: fc2(a) + fc2(b) == fc2(a + b).
    hsum = jnp.sum(h, axis=-1, keepdims=True)                            # (Cr, 1)
    gate = jax.nn.sigmoid(
        jnp.dot(w2, hsum, preferred_element_type=jnp.float32))           # (C, 1)

    # Cast only the tiny gate (documented: for bf16 x the gate is quantized
    # to bf16, within tolerance of the f32 reference).
    o_ref[0] = (x * gate.astype(x.dtype)).astype(o_ref.dtype)


def _ca_reduce_kernel(hw_total, x_ref, w1_ref, w2_ref, gate_ref, sum_sc, max_sc):
    """Pass A: accumulate per-channel sum/max over HW tiles; finalize gate."""
    t = pl.program_id(1)
    nt = pl.num_programs(1)

    x = x_ref[0]                                                     # (C, Thw)
    c, thw = x.shape

    @pl.when(t == 0)
    def _():
        sum_sc[...] = jnp.zeros_like(sum_sc)
        max_sc[...] = jnp.full_like(max_sc, -jnp.inf)

    if hw_total % thw != 0:
        # Partial last tile: mask padding lanes (zeros for the sum, -inf for
        # the max) so garbage never corrupts the statistics.
        lane = jax.lax.broadcasted_iota(jnp.int32, (c, thw), 1)
        valid = (t * thw + lane) < hw_total
        x_sum = jnp.where(valid, x, jnp.zeros((), x.dtype))
        x_max = jnp.where(valid, x, jnp.array(-jnp.inf, x.dtype))
    else:
        x_sum = x
        x_max = x

    sum_sc[...] += jnp.sum(x_sum, axis=-1, keepdims=True, dtype=jnp.float32)
    max_sc[...] = jnp.maximum(
        max_sc[...], jnp.max(x_max, axis=-1, keepdims=True).astype(jnp.float32))

    @pl.when(t == nt - 1)
    def _():
        avg = sum_sc[...] * (1.0 / hw_total)                         # true HW
        pooled = jnp.concatenate([avg, max_sc[...]], axis=-1)        # (C, 2)
        w1 = w1_ref[...].astype(jnp.float32)
        w2 = w2_ref[...].astype(jnp.float32)
        h = jnp.maximum(
            jnp.dot(w1, pooled, preferred_element_type=jnp.float32), 0.0)
        hsum = jnp.sum(h, axis=-1, keepdims=True)
        gate_ref[0] = jax.nn.sigmoid(
            jnp.dot(w2, hsum, preferred_element_type=jnp.float32))


def _ca_scale_kernel(gate_ref, x_ref, o_ref):
    """Pass B: lane-dense scale of an x tile by the per-channel gate."""
    x = x_ref[0]                                                     # (C, Thw)
    g = gate_ref[0].astype(x.dtype)                                  # (C, 1)
    o_ref[0] = (x * g).astype(o_ref.dtype)


# --------------------------- wrapper ---------------------------------------- #


def channel_attention(x, w1, w2, *, force_two_pass=False, thw=None, in_place=False):
    """ChannelAttention forward.

    x:  (N, C, H, W) NCHW input.
    w1: (C // 16, C)  fc1 1x1-conv weight (squeezed), natural PyTorch layout.
    w2: (C, C // 16)  fc2 1x1-conv weight (squeezed), natural PyTorch layout.
    """
    N, C, H, W = x.shape
    Cr = w1.shape[0]
    HW = H * W
    itemsize = jnp.dtype(x.dtype).itemsize

    # Free view of the NCHW buffer: no transpose, HW lands on the lane axis.
    x_l = x.reshape(N, C, HW)

    cap = _vmem_budget_bytes()
    slack = 4 << 20
    w_vmem = 2 * (_padded_vmem_bytes(w1) + _padded_vmem_bytes(w2))   # double-buffered
    w_hbm = (w1.size + w2.size) * jnp.dtype(w1.dtype).itemsize

    # Resident single-pass budget: double-buffered in + out blocks + weights.
    single_needed = 4 * C * HW * itemsize + w_vmem + slack

    if not force_two_pass and single_needed <= cap:
        # ---------- single pass: one HBM read + one HBM write of x ----------
        out = pl.pallas_call(
            _ca_single_pass_kernel,
            out_shape=jax.ShapeDtypeStruct((N, C, HW), x.dtype),
            grid=(N,),
            in_specs=[
                pl.BlockSpec((1, C, HW), lambda n: (n, 0, 0)),
                pl.BlockSpec((Cr, C), lambda n: (0, 0)),
                pl.BlockSpec((C, Cr), lambda n: (0, 0)),
            ],
            out_specs=pl.BlockSpec((1, C, HW), lambda n: (n, 0, 0)),
            compiler_params=pltpu.CompilerParams(
                dimension_semantics=("parallel",),
                vmem_limit_bytes=int(min(max(single_needed, 32 << 20), cap)),
            ),
            cost_estimate=pl.CostEstimate(
                flops=int(N * (3 * C * HW + 6 * Cr * C)),
                transcendentals=int(N * C),
                bytes_accessed=int(2 * N * C * HW * itemsize + w_hbm),
            ),
            input_output_aliases=({0: 0} if in_place else {}),
        )(x_l, w1, w2)
        return out.reshape(N, C, H, W)

    # ---------- HW-tiled two-pass fallback (reduce, then scale) ----------
    if thw is None:
        budget = cap - slack - w_vmem
        thw = max((budget // (4 * C * itemsize)) // 128 * 128, 512)
    thw = int(max(min(thw, _round_up(HW, 128)), 128))
    n_t = -(-HW // thw)

    # Pass A: per-(batch, channel) sum/max accumulated over HW tiles; the gate
    # is finalized on the last tile (reduction axis last, "arbitrary").
    reduce_needed = 2 * C * thw * itemsize + w_vmem + 4 * _round_up(C, 8) * 128 * 4 + slack
    gate = pl.pallas_call(
        functools.partial(_ca_reduce_kernel, HW),
        out_shape=jax.ShapeDtypeStruct((N, C, 1), jnp.float32),
        grid=(N, n_t),
        in_specs=[
            pl.BlockSpec((1, C, thw), lambda n, t: (n, 0, t)),
            pl.BlockSpec((Cr, C), lambda n, t: (0, 0)),
            pl.BlockSpec((C, Cr), lambda n, t: (0, 0)),
        ],
        out_specs=pl.BlockSpec((1, C, 1), lambda n, t: (n, 0, 0)),
        scratch_shapes=[
            pltpu.VMEM((C, 1), jnp.float32),   # running sum
            pltpu.VMEM((C, 1), jnp.float32),   # running max
        ],
        compiler_params=pltpu.CompilerParams(
            dimension_semantics=("parallel", "arbitrary"),
            vmem_limit_bytes=int(min(max(reduce_needed, 32 << 20), cap)),
        ),
        cost_estimate=pl.CostEstimate(
            flops=int(N * (2 * C * HW + 6 * Cr * C)),
            transcendentals=int(N * C),
            bytes_accessed=int(N * C * HW * itemsize + N * C * 4 + w_hbm),
        ),
    )(x_l, w1, w2)

    # Pass B: lane-dense scale; both grid axes "parallel" so v7x's two
    # TensorCores split the DMA-bound work even when per-device N == 1.
    scale_needed = 4 * C * thw * itemsize + 2 * _round_up(C, 8) * 128 * 4 + slack
    out = pl.pallas_call(
        _ca_scale_kernel,
        out_shape=jax.ShapeDtypeStruct((N, C, HW), x.dtype),
        grid=(N, n_t),
        in_specs=[
            pl.BlockSpec((1, C, 1), lambda n, t: (n, 0, 0)),
            pl.BlockSpec((1, C, thw), lambda n, t: (n, 0, t)),
        ],
        out_specs=pl.BlockSpec((1, C, thw), lambda n, t: (n, 0, t)),
        compiler_params=pltpu.CompilerParams(
            dimension_semantics=("parallel", "parallel"),
            vmem_limit_bytes=int(min(max(scale_needed, 32 << 20), cap)),
        ),
        cost_estimate=pl.CostEstimate(
            flops=int(N * C * HW),
            transcendentals=0,
            bytes_accessed=int(2 * N * C * HW * itemsize + N * C * 4),
        ),
        input_output_aliases=({1: 0} if in_place else {}),
    )(gate, x_l)
    return out.reshape(N, C, H, W)


# --------------------------- reference & test ------------------------------- #


def _reference(x, w1, w2):
    # Pure-JAX reference mirroring the PyTorch ChannelAttention module (NCHW).
    avg = jnp.mean(x, axis=(2, 3))                         # (N, C)
    mx = jnp.max(x, axis=(2, 3))                           # (N, C)

    def mlp(v):
        h = jnp.maximum(v @ w1.T, 0.0)                     # (N, Cr)
        return h @ w2.T                                    # (N, C)

    gate = jax.nn.sigmoid(mlp(avg) + mlp(mx))              # (N, C)
    return x * gate[:, :, None, None]


if __name__ == "__main__":
    # in_planes must be >= 16 (module uses in_planes // 16); DecoderBlock d4
    # in DAHNet runs ChannelAttention(32), so use C = 32.
    N, C, H, W = 2, 32, 16, 16
    Cr = C // 16

    key = jax.random.PRNGKey(0)
    kx, k1, k2 = jax.random.split(key, 3)
    x = jax.random.normal(kx, (N, C, H, W), dtype=jnp.float32)
    # Conv2d(C, Cr, 1, bias=False).weight -> (Cr, C, 1, 1) squeezed to (Cr, C).
    w1 = jax.random.normal(k1, (Cr, C), dtype=jnp.float32) * (1.0 / np.sqrt(C))
    # Conv2d(Cr, C, 1, bias=False).weight -> (C, Cr, 1, 1) squeezed to (C, Cr).
    w2 = jax.random.normal(k2, (C, Cr), dtype=jnp.float32) * (1.0 / np.sqrt(Cr))

    y_ref = _reference(x, w1, w2)

    # 1) Resident single-pass path (fits VMEM easily at this shape).
    y1 = channel_attention(x, w1, w2)
    jax.block_until_ready(y1)
    assert y1.shape == x.shape
    np.testing.assert_allclose(np.asarray(y1), np.asarray(y_ref), rtol=1e-5, atol=1e-5)

    # 2) HW-tiled two-pass fallback, forced, small tile -> 2 HW tiles of 128.
    y2 = channel_attention(x, w1, w2, force_two_pass=True, thw=128)
    jax.block_until_ready(y2)
    np.testing.assert_allclose(np.asarray(y2), np.asarray(y_ref), rtol=1e-5, atol=1e-5)

    # 3) Ragged spatial size (HW=192, tiles of 128) -> exercises the masked
    #    partial last tile in the reduce pass.
    x3 = jax.random.normal(jax.random.PRNGKey(1), (1, C, 12, 16), dtype=jnp.float32)
    y3 = channel_attention(x3, w1, w2, force_two_pass=True, thw=128)
    jax.block_until_ready(y3)
    np.testing.assert_allclose(
        np.asarray(y3), np.asarray(_reference(x3, w1, w2)), rtol=1e-5, atol=1e-5)

    print("KERNEL_OK")
</pallas_src>

<mosaic_0001>
module attributes {stable_mosaic.version = 11 : i64} {
  func.func @_ca_single_pass_kernel(%arg0: i32, %arg1: memref<1x32x256xf32, #tpu.memory_space<vmem>>, %arg2: memref<2x32xf32, #tpu.memory_space<vmem>>, %arg3: memref<32x2xf32, #tpu.memory_space<vmem>>, %arg4: memref<1x32x256xf32, #tpu.memory_space<vmem>>) attributes {dimension_semantics = [#tpu.dimension_semantics<parallel>], iteration_bounds = array<i64: 2>, scalar_prefetch = 0 : i64, scratch_operands = 0 : i64, tpu.core_type = #tpu.core_type<tc>, window_params = [{transform_indices = @transform_0, window_bounds = array<i64: 1, 32, 256>}, {pipeline_mode = #tpu.pipeline_mode<synchronous>, transform_indices = @transform_1, window_bounds = array<i64: 2, 32>}, {pipeline_mode = #tpu.pipeline_mode<synchronous>, transform_indices = @transform_2, window_bounds = array<i64: 32, 2>}, {transform_indices = @transform_3, window_bounds = array<i64: 1, 32, 256>}]} {
    %c0 = arith.constant 0 : index
    %c0_0 = arith.constant 0 : index
    %c0_1 = arith.constant 0 : index
    %0 = vector.load %arg1[%c0, %c0_0, %c0_1] : memref<1x32x256xf32, #tpu.memory_space<vmem>>, vector<1x32x256xf32>
    %1 = vector.shape_cast %0 : vector<1x32x256xf32> to vector<32x256xf32>
    %cst = arith.constant dense<0.000000e+00> : vector<32xf32>
    %2 = vector.multi_reduction <add>, %1, %cst [1] : vector<32x256xf32> to vector<32xf32>
    %3 = vector.shape_cast %2 : vector<32xf32> to vector<32x1xf32>
    %cst_2 = arith.constant 2.560000e+02 : f32
    %4 = vector.broadcast %cst_2 : f32 to vector<32x1xf32>
    %5 = arith.divf %3, %4 : vector<32x1xf32>
    %cst_3 = arith.constant dense<0xFF800000> : vector<32xf32>
    %6 = vector.multi_reduction <maximumf>, %1, %cst_3 [1] : vector<32x256xf32> to vector<32xf32>
    %7 = vector.shape_cast %6 : vector<32xf32> to vector<32x1xf32>
    %8 = tpu.concatenate %5, %7 in 1 : vector<32x1xf32>, vector<32x1xf32> -> vector<32x2xf32>
    %c0_4 = arith.constant 0 : index
    %c0_5 = arith.constant 0 : index
    %9 = vector.load %arg2[%c0_4, %c0_5] : memref<2x32xf32, #tpu.memory_space<vmem>>, vector<2x32xf32>
    %c0_6 = arith.constant 0 : index
    %c0_7 = arith.constant 0 : index
    %10 = vector.load %arg3[%c0_6, %c0_7] : memref<32x2xf32, #tpu.memory_space<vmem>>, vector<32x2xf32>
    %cst_8 = arith.constant dense<0.000000e+00> : vector<2x2xf32>
    %11 = tpu.matmul %9, %8, %cst_8 {dimension_numbers = #tpu.dot_dimension_numbers<[1], [0], [0], [1], [0, 0, 1, 1], [], []>} : vector<2x32xf32>, vector<32x2xf32>, vector<2x2xf32> -> vector<2x2xf32>
    %cst_9 = arith.constant 0.000000e+00 : f32
    %12 = vector.broadcast %cst_9 : f32 to vector<2x2xf32>
    %13 = arith.maximumf %11, %12 : vector<2x2xf32>
    %cst_10 = arith.constant dense<0.000000e+00> : vector<2xf32>
    %14 = vector.multi_reduction <add>, %13, %cst_10 [1] : vector<2x2xf32> to vector<2xf32>
    %15 = vector.shape_cast %14 : vector<2xf32> to vector<2x1xf32>
    %cst_11 = arith.constant dense<0.000000e+00> : vector<32x1xf32>
    %16 = tpu.matmul %10, %15, %cst_11 {dimension_numbers = #tpu.dot_dimension_numbers<[1], [0], [0], [1], [0, 0, 1, 1], [], []>} : vector<32x2xf32>, vector<2x1xf32>, vector<32x1xf32> -> vector<32x1xf32>
    %17 = arith.negf %16 : vector<32x1xf32>
    %18 = math.exp %17 : vector<32x1xf32>
    %cst_12 = arith.constant 1.000000e+00 : f32
    %19 = vector.broadcast %cst_12 : f32 to vector<32x1xf32>
    %20 = arith.addf %19, %18 : vector<32x1xf32>
    %21 = arith.divf %19, %20 : vector<32x1xf32>
    %22 = vector.broadcast %21 : vector<32x1xf32> to vector<32x256xf32>
    %23 = arith.mulf %1, %22 : vector<32x256xf32>
    %c0_13 = arith.constant 0 : index
    %c0_14 = arith.constant 0 : index
    %c0_15 = arith.constant 0 : index
    %24 = vector.load %arg4[%c0_13, %c0_14, %c0_15] : memref<1x32x256xf32, #tpu.memory_space<vmem>>, vector<1x32x256xf32>
    %25 = vector.shape_cast %24 : vector<1x32x256xf32> to vector<32x256xf32>
    %26 = vector.shape_cast %23 : vector<32x256xf32> to vector<1x32x256xf32>
    tpu.vector_store %arg4[%c0_13, %c0_14, %c0_15], %26 {strides = array<i32>} : memref<1x32x256xf32, #tpu.memory_space<vmem>>, vector<1x32x256xf32>,
    return
  }
  func.func @transform_0(%arg0: i32) -> (i32, i32, i32) {
    %c0_i32 = arith.constant 0 : i32
    %c0_i32_0 = arith.constant 0 : i32
    %c0_i32_1 = arith.constant 0 : i32
    return %arg0, %c0_i32, %c0_i32_0 : i32, i32, i32
  }
  func.func @transform_1(%arg0: i32) -> (i32, i32) {
    %c0_i32 = arith.constant 0 : i32
    %c0_i32_0 = arith.constant 0 : i32
    %c0_i32_1 = arith.constant 0 : i32
    return %c0_i32, %c0_i32_0 : i32, i32
  }
  func.func @transform_2(%arg0: i32) -> (i32, i32) {
    %c0_i32 = arith.constant 0 : i32
    %c0_i32_0 = arith.constant 0 : i32
    %c0_i32_1 = arith.constant 0 : i32
    return %c0_i32, %c0_i32_0 : i32, i32
  }
  func.func @transform_3(%arg0: i32) -> (i32, i32, i32) {
    %c0_i32 = arith.constant 0 : i32
    %c0_i32_0 = arith.constant 0 : i32
    %c0_i32_1 = arith.constant 0 : i32
    return %arg0, %c0_i32, %c0_i32_0 : i32, i32, i32
  }
}

</mosaic_0001>

<bundles_post_ra>
// kernel: tpu_custom_call.1
= control target key start
LH: loop header
LB: loop body
LE: loop exit
PB: predicated region body
PF: predicated region fallthrough
CT: control target
= control target key end

     0   :  { %8 = vsyncpa [#allocation3], 0  ;;  %s935_s0 = inlined_call_operand.hbm [shape: f32[2,32,256], index: 0, kind: input, shape index: {}]   ;;  %s936_s1 = inlined_call_operand.vmem [shape: f32[2,32], index: 1, kind: input, shape index: {}]   ;;  %s937_s2 = inlined_call_operand.vmem [shape: f32[32,2], index: 2, kind: input, shape index: {}]   ;;  %s938_s3 = inlined_call_operand.hbm [shape: f32[2,32,256], index: 3, kind: output, shape index: {}]  }
   0x1   :  { %10 = vsyncpa [#allocation3 + $0x1], 0 }
   0x2   :  { %11 = vsyncpa [#allocation4], 0 }
   0x3   :  { %13 = vsyncpa [#allocation4 + $0x1], 0  ;;  %s745_s12 = smov 0   ;;  %s747_s13 = smov 0  }
   0x4   :  { %s749_s14 = smov 0   ;;  %s751_s15 = smov 0  }
   0x5 LB: > { %s766_s16 = sadd.s32 4294967295, %s717_s15   ;;  %s520_s17 = sadd.s32 4294967294, %s717_s15   ;;  %s717_s15 = sphi %s751_s15, %s948_s15   ;;  %s713_s14 = sphi %s749_s14, %s947_s14   ;;  %s709_s13 = sphi %s747_s13, %s946_s13   ;;  %s705_s12 = sphi %s745_s12, %s945_s12  }
   0x6   : > { %s770_s18 = sadd.s32 1, %s717_s15   ;;  %s26_s19 = sadd.s32 1, %s713_s14 }
   0x7   : > { %s23_s20 = ssub.s32 %s717_s15, %s770_s18  ;;  %p33_p0 = scmp.ne.s32.totalorder %s713_s14, %s709_s13 }
   0x8   : > { %p24_p1 = scmp.eq.s32.totalorder %s23_s20, 0  ;;  %p34_p2 = scmp.eq.s32.totalorder %s717_s15, 0 }
   0x9   : > { %p39_p3 = scmp.ne.s32.totalorder %s709_s13, %s705_s12  ;;  %p40_p4 = scmp.eq.s32.totalorder %s766_s16, 0 }
   0xa   : > { %s782_s21 = scalar_select %p24_p1, %s713_s14, %s26_s19  }
   0xb   : > { %p784_p5 = por %p34_p2, %p33_p0  ;;  %p788_p6 = por %p40_p4, %p39_p3 }
   0xc   : > { %p105_p7 = scmp.eq.s32.totalorder %s766_s16, 1  ;;  %p111_p8 = scmp.eq.s32.totalorder %s520_s17, 1 }
   0xd   : > { %p560_p10 = scmp.lt.s32.totalorder %s717_s15, 2  ;;  %s137_s26 = sand.u32 1, %s713_s14  }
   0xe   : > { %p795_p11 = por %p105_p7, %p33_p0  ;;  %p799_p12 = por %p111_p8, %p39_p3 }
   0xf   : > { %s544_s27 = sshll.u32 %s717_s15, 6  ;;  %s523_s28 = sshll.u32 %s137_s26, 6 }
  0x10   : > { %s146_s4 = scalar_lea.hbm %s935_s0, %s544_s27  ;;  %s141_s6 = scalar_lea.vmem [#allocation2], %s523_s28 }
  0x11   : > { %s147_s5 = sshll.u32 %s146_s4, 4  ;;  %s149_s7 = sshll.u32 %s141_s6, 4  ;;  %s148_s5 = int_to_ptr.hbm [resolvable:$true] %s147_s5  ;;  %s150_s7 = int_to_ptr.vmem [resolvable:$true] %s149_s7 }
  0x12   : > { %p810_p13 = pnand %p560_p10, %p784_p5  ;;  %p526_p0 = scmp.ge.s32.totalorder %s717_s15, 1 }
  0x13   : > { %p157_p1 = scmp.lt.s32.totalorder %s717_s15, 3  ;;  %s138_s9 = scalar_lea.sflag [#allocation3], %s137_s26 }
  0x14   : > { %s621_s10 = sshra.s32 %s148_s5, 4  ;;  %p625_p3 = pneg %p810_p13  ;;  %s622_s10 = int_to_ptr.hbm [resolvable:$true] %s621_s10 }
  0x15   : > { %s623_s11 = scalar_lea.hbm %s622_s10, 64  ;;  %s628_s20 = scalar_lea.hbm %s935_s0, 128 }
  0x16   : > { %p624_p2 = scmp.ne.s32.totalorder %s622_s10, %s623_s11  ;;  %p629_p5 = scmp.lt.s32.totalorder %s622_s10, %s935_s0 }
  0x17   : > { %p630_p8 = scmp.lt.s32.totalorder %s628_s20, %s623_s11 }
  0x18   : > { %p626_p4 = pnand %p625_p3, %p624_p2 }
  0x19   : > { %p631_p10 = por %p630_p8, %p629_p5 }
  0x1a   : > { %p627_p7 = pneg %p626_p4 }
  0x1c   : > { %p632_p9 = pnand %p631_p10, %p627_p7 }
  0x1e   : > { %635 = shalt.err (!%p632_p9)
}
  0x1f   : > { %s719_s26 = smov 256   ;;  %s720_s28 = smov 16  }
  0x20   : > { %555 = dma.hbm_to_vmem [thread:$0]  (!%p810_p13), %s148_s5, 1024, %s150_s7, %s138_s9, %s719_s26, %s719_s26, %s720_s28  }
  0x21   : > { %p158_p2 = pnand %p526_p0, %p157_p1 }
  0x22   : > { %s831_s29 = sand.u32 (!%p158_p2), 1, %s709_s13  }
  0x23   : > { %161 = sbr.rel (%p158_p2) target bundleno = 709 (0x2c5), region = 32  ;;  %s527_s30 = sshll.u32 (!%p158_p2), %s831_s29, 6 }
  0x24   : > { %s164_s4 = scalar_lea.sflag (!%p158_p2), [#allocation3], %s831_s29  ;;  %s167_s6 = scalar_lea.vmem (!%p158_p2), [#allocation2], %s527_s30 }
  0x28   : > { %696 = dma.done.wait (%p788_p6), %s164_s4, 1024  }
  0x29   : > { %698 = vsyncadd (%p788_p6), %s164_s4, 4294966272  ;;  %v841_v0 = vld [vmem:[%s167_s6 + $0x30] sm:$0xff]  ;;  %v843_v1 = vld [vmem:[%s167_s6 + $0x38] sm:$0xff]  ;;  %v721_v16 = vmov 256.0   ;;  %vm234_vm1 = vcmask 7168   ;;  %vm244_vm2 = vcmask 261120  }
  0x2a   : > { %v845_v2 = vld [vmem:[%s167_s6 + $0x20] sm:$0xff]  ;;  %v208_v3 = vadd.f32 %v843_v1, %v841_v0  ;;  %v231_v4 = vmax.f32 %v841_v0, %v843_v1  ;;  %v851_v5 = vld [vmem:[%s167_s6 + $0x28] sm:$0xff]  ;;  %v855_v7 = vld [vmem:[%s167_s6 + $0x10] sm:$0xff]  ;;  %603 = vrcp.f32 %v721_v16  ;;  %vm269_vm3 = vcmask 9216   ;;  %s190_s22 = scalar_lea.vmem [#allocation5], %s527_s30  ;;  %s545_s27 = sshll.u32 %s766_s16, 6 }
  0x2b   : > { %v228_v6 = vmax.f32 %v845_v2, %v851_v5  ;;  %v857_v8 = vld [vmem:[%s167_s6 + $0x18] sm:$0xff]  ;;  %v859_v9 = vld [vmem:[%s167_s6] sm:$0xff]  ;;  %v861_v10 = vld [vmem:[%s167_s6 + $0x8] sm:$0xff]  ;;  %v205_v11 = vadd.f32 %v851_v5, %v845_v2  ;;  %vm286_vm4 = vcmask 1041408   ;;  %vm273_vm5 = vcmask 15360   ;;  %s443_s4 = scalar_lea.hbm %s938_s3, %s545_s27  ;;  %s444_s30 = sshll.u32 %s190_s22, 4  ;;  %s445_s30 = int_to_ptr.vmem [resolvable:$true] %s444_s30 }
  0x2c   : > { %209 = vadd.xlane.f32.xlu0 %v208_v3  ;;  %232 = vmax.xlane.f32.xlu1 %v231_v4  ;;  %v202_v12 = vadd.f32 %v857_v8, %v855_v7  ;;  %v199_v13 = vadd.f32 %v861_v10, %v859_v9  ;;  %v225_v14 = vmax.f32 %v855_v7, %v857_v8  ;;  %v239_v39 = vld [vmem:[%s936_s1] sm:$0x3]  ;;  %v241_v45 = vld [vmem:[%s937_s2 + $0x8] sm:$0xff]  ;;  %v243_v46 = vld [vmem:[%s937_s2 + $0x18] sm:$0xff]  ;;  %v722_v48 = vmov 0   ;;  %s446_s16 = sshll.u32 %s443_s4, 4  ;;  %s447_s16 = int_to_ptr.hbm [resolvable:$true] %s446_s16 }
  0x2d   : > { %229 = vmax.xlane.f32.xlu2 %v228_v6  ;;  %v222_v15 = vmax.f32 %v859_v9, %v861_v10  ;;  %v240_v43 = vld [vmem:[%s937_s2] sm:$0xff]  ;;  %v242_v47 = vld [vmem:[%s937_s2 + $0x10] sm:$0xff]  ;;  %600 = vset.pattern.permute.xlu0 %v722_v48  ;;  %s432_s6 = scalar_lea.sflag [#allocation4], %s831_s29  ;;  %s665_s23 = sshra.s32 %s447_s16, 4  ;;  %s666_s23 = int_to_ptr.hbm [resolvable:$true] %s665_s23 }
  0x2e   : > { %601 = vset.pattern.permute.xlu1 %v722_v48  ;;  %602 = vset.pattern.permute.xlu2 %v722_v48  ;;  %s667_s5 = scalar_lea.hbm %s666_s23, 64  ;;  %s671_s9 = scalar_lea.hbm %s938_s3, 128 }
  0x2f   : > { %p668_p6 = scmp.ne.s32.totalorder %s666_s23, %s667_s5  ;;  %p672_p0 = scmp.lt.s32.totalorder %s666_s23, %s938_s3 }
  0x30   : > { %v604_v17 = vpop.eup %603  ;;  %p673_p1 = scmp.lt.s32.totalorder %s671_s9, %s667_s5 }
  0x31   : > { %v212_v18 = vmul.f32 256.0, %v604_v17  ;;  %vm216_vm0 = vweird.f32 %v604_v17  ;;  %p669_p9 = pnand %p668_p6, %p795_p11 }
  0x32   : > { %p674_p3 = por %p673_p1, %p672_p0 }
  0x33   : > { %v213_v19 = vsub.f32 1.0, %v212_v18  ;;  %p670_p13 = pneg %p669_p9 }
  0x34   : > { %206 = vadd.xlane.f32.xlu0 %v205_v11  ;;  %203 = vadd.xlane.f32.xlu1 %v202_v12 }
  0x35   : > { %200 = vadd.xlane.f32.xlu2 %v199_v13  ;;  %v214_v20 = vmul.f32 %v604_v17, %v213_v19  ;;  %p675_p4 = pnand %p674_p3, %p670_p13 }
  0x37   : > { %v215_v21 = vadd.f32 %v604_v17, %v214_v20 }
  0x39   : > { %v217_v22 = vsel %vm216_vm0, %v604_v17, %v215_v21 }
  0x3c   : > { %226 = vmax.xlane.f32.xlu0 %v225_v14  ;;  %223 = vmax.xlane.f32.xlu1 %v222_v15 }
  0x9f   : > { %v210_v23 = vpop.xlane.xlu0 %209  ;;  %v233_v24 = vpop.xlane.xlu1 %232 }
  0xa0   : > { %v221_v25 = vmul.f32 %v217_v22, %v210_v23  ;;  %v230_v26 = vpop.xlane.xlu2 %229 }
  0xa2   : > { %v238_v27 = vsel %vm234_vm1, %v221_v25, %v233_v24 }
  0xa3   : > { %260 = vmatpush.msra.mxu0 %v238_v27 }
  0xa7   : > { %v207_v28 = vpop.xlane.xlu0 %206  ;;  %v204_v29 = vpop.xlane.xlu1 %203 }
  0xa8   : > { %v220_v30 = vmul.f32 %v217_v22, %v207_v28  ;;  %v201_v31 = vpop.xlane.xlu2 %200  ;;  %v219_v34 = vmul.f32 %v217_v22, %v204_v29 }
  0xa9   : > { %v218_v33 = vmul.f32 %v217_v22, %v201_v31 }
  0xaa   : > { %v237_v32 = vsel %vm234_vm1, %v220_v30, %v230_v26 }
  0xab   : > { %261 = vmatpush.msra.mxu0 %v237_v32 }
  0xaf   : > { %v227_v35 = vpop.xlane.xlu0 %226  ;;  %v224_v36 = vpop.xlane.xlu1 %223 }
  0xb0   : > { %v236_v37 = vsel %vm234_vm1, %v219_v34, %v227_v35  ;;  %v235_v38 = vsel %vm234_vm1, %v218_v33, %v224_v36 }
  0xb1   : > { %262 = vmatpush.msra.mxu0 %v236_v37 }
  0xb3   : > { %263 = vmatpush.msra.mxu0 %v235_v38 }
  0xb4   : > { %529 = vmatmul.msk.f32.vlgmr.msra.gmra.mxu0 %vm244_vm2, %v239_v39 }
 0x131   : > { %v265_v40 = vpop.f32.mrf.mxu0 }
 0x132   : > { %v268_v41 = vmax.f32 %v265_v40, 0.0 }
 0x134   : > { %v270_v42 = vsel %vm269_vm3, %v268_v41, 0.0 }
 0x135   : > { %271 = vadd.xlane.f32.xlu2 %v270_v42 }
 0x1a8   : > { %v272_v44 = vpop.xlane.xlu2 %271 }
 0x1a9   : > { %530 = vmatpush.msk.msra.mxu1 %vm286_vm4, %v272_v44  ;;  %546 = vmatpush.msk.msra.mxu2 %vm286_vm4, %v272_v44 }
 0x1aa   : > { %547 = vmatpush.msk.msra.mxu3 %vm286_vm4, %v272_v44  ;;  %531 = vmatmul.msk.f32.vlgmr.msra.gmra.mxu1 %vm273_vm5, %v240_v43 }
 0x1ab   : > { %532 = vmatmul.msk.f32.vlgmr.msra.gmra.mxu2 %vm273_vm5, %v241_v45  ;;  %534 = vmatmul.msk.f32.vlgmr.msra.gmra.mxu3 %vm273_vm5, %v243_v46 }
 0x1b3   : > { %533 = vmatmul.msk.f32.gmra.mxu2 %vm273_vm5, %v242_v47 }
 0x227   : > { %v307_v49 = vpop.f32.mrf.mxu1 }
 0x228   : > { %v535_v50 = vmul.f32 -1.442695, %v307_v49 }
 0x22a   : > { %605 = vpow2.f32 %v535_v50 }
 0x22e   : > { %v310_v51 = vpop.f32.mrf.mxu2  ;;  %v316_v52 = vpop.f32.mrf.mxu3 }
 0x22f   : > { %v536_v53 = vmul.f32 -1.442695, %v310_v51  ;;  %v538_v54 = vmul.f32 -1.442695, %v316_v52 }
 0x230   : > { %v606_v55 = vpop.eup %605 }
 0x231   : > { %v331_v56 = vadd.f32 1.0, %v606_v55  ;;  %607 = vpow2.f32 %v536_v53 }
 0x232   : > { %609 = vpow2.f32 %v538_v54 }
 0x233   : > { %611 = vrcp.f32 %v331_v56  ;;  %vm340_vm6 = vweird.f32 %v331_v56  ;;  %v346_v6 = vand.u32 2147483648, %v331_v56  ;;  %v344_v12 = vand.u32 2147483647, %v331_v56 }
 0x235   : > { %v347_v17 = vor.u32 1.1754944e-38, %v346_v6  ;;  %vm345_vm9 = vcmp.eq.f32.partialorder %v344_v12, 8.507059e+37 }
 0x236   : > { %v313_v57 = vpop.f32.mrf.mxu2 }
 0x237   : > { %v608_v58 = vpop.eup %607  ;;  %v537_v59 = vmul.f32 -1.442695, %v313_v57 }
 0x238   : > { %v610_v60 = vpop.eup %609  ;;  %v332_v61 = vadd.f32 1.0, %v608_v58 }
 0x239   : > { %v612_v62 = vpop.eup %611  ;;  %613 = vpow2.f32 %v537_v59  ;;  %v334_v63 = vadd.f32 1.0, %v610_v60 }
 0x23a   : > { %615 = vrcp.f32 %v332_v61  ;;  %v336_v3 = vmul.f32 %v612_v62, %v331_v56  ;;  %vm341_vm7 = vweird.f32 %v612_v62  ;;  %v361_v23 = vand.u32 2147483648, %v332_v61 }
 0x23b   : > { %617 = vrcp.f32 %v334_v63  ;;  %vm342_vm8 = vmor %vm340_vm6, %vm341_vm7  ;;  %v359_v25 = vand.u32 2147483647, %v332_v61  ;;  %vm355_vm11 = vweird.f32 %v332_v61  ;;  %vm385_vm2 = vweird.f32 %v334_v63 }
 0x23c   : > { %v337_v4 = vsub.f32 1.0, %v336_v3  ;;  %v362_v29 = vor.u32 1.1754944e-38, %v361_v23  ;;  %v391_v43 = vand.u32 2147483648, %v334_v63  ;;  %v389_v45 = vand.u32 2147483647, %v334_v63 }
 0x23d   : > { %vm360_vm13 = vcmp.eq.f32.partialorder %v359_v25, 8.507059e+37 }
 0x23e   : > { %v338_v11 = vmul.f32 %v612_v62, %v337_v4  ;;  %v392_v46 = vor.u32 1.1754944e-38, %v391_v43  ;;  %vm390_vm5 = vcmp.eq.f32.partialorder %v389_v45, 8.507059e+37 }
 0x23f   : > { %v614_v13 = vpop.eup %613 }
 0x240   : > { %v616_v14 = vpop.eup %615  ;;  %v333_v15 = vadd.f32 1.0, %v614_v13  ;;  %v339_v16 = vadd.f32 %v612_v62, %v338_v11 }
 0x241   : > { %v351_v18 = vmul.f32 %v616_v14, %v332_v61  ;;  %v618_v22 = vpop.eup %617  ;;  %vm356_vm10 = vweird.f32 %v616_v14 }
 0x242   : > { %619 = vrcp.f32 %v333_v15  ;;  %v343_v19 = vsel %vm342_vm8, %v612_v62, %v339_v16  ;;  %v381_v27 = vmul.f32 %v618_v22, %v334_v63  ;;  %vm357_vm12 = vmor %vm355_vm11, %vm356_vm10  ;;  %v376_v35 = vand.u32 2147483648, %v333_v15 }
 0x243   : > { %v348_v20 = vsel %vm345_vm9, %v347_v17, %v343_v19  ;;  %v352_v21 = vsub.f32 1.0, %v351_v18  ;;  %vm370_vm14 = vweird.f32 %v333_v15  ;;  %v374_v37 = vand.u32 2147483647, %v333_v15 }
 0x244   : > { %397 = vperm.xlu0 %600, %v348_v20   ;;  %v382_v34 = vsub.f32 1.0, %v381_v27  ;;  %v377_v40 = vor.u32 1.1754944e-38, %v376_v35  ;;  %vm386_vm3 = vweird.f32 %v618_v22 }
 0x245   : > { %v353_v24 = vmul.f32 %v616_v14, %v352_v21  ;;  %vm375_vm1 = vcmp.eq.f32.partialorder %v374_v37, 8.507059e+37  ;;  %vm387_vm4 = vmor %vm385_vm2, %vm386_vm3 }
 0x246   : > { %v383_v39 = vmul.f32 %v618_v22, %v382_v34 }
 0x247   : > { %v354_v26 = vadd.f32 %v616_v14, %v353_v24 }
 0x248   : > { %v620_v28 = vpop.eup %619  ;;  %v384_v44 = vadd.f32 %v618_v22, %v383_v39 }
 0x249   : > { %v358_v30 = vsel %vm357_vm12, %v616_v14, %v354_v26  ;;  %v366_v31 = vmul.f32 %v620_v28, %v333_v15  ;;  %vm371_vm15 = vweird.f32 %v620_v28 }
 0x24a   : > { %v363_v32 = vsel %vm360_vm13, %v362_v29, %v358_v30  ;;  %vm372_vm0 = vmor %vm370_vm14, %vm371_vm15  ;;  %v388_v47 = vsel %vm387_vm4, %v618_v22, %v384_v44 }
 0x24b   : > { %402 = vperm.xlu1 %601, %v363_v32   ;;  %v367_v33 = vsub.f32 1.0, %v366_v31  ;;  %v393_v48 = vsel %vm390_vm5, %v392_v46, %v388_v47 }
 0x24d   : > { %v368_v36 = vmul.f32 %v620_v28, %v367_v33 }
 0x24f   : > { %v369_v38 = vadd.f32 %v620_v28, %v368_v36 }
 0x251   : > { %v373_v41 = vsel %vm372_vm0, %v620_v28, %v369_v38 }
 0x252   : > { %v378_v42 = vsel %vm375_vm1, %v377_v40, %v373_v41 }
 0x253   : > { %407 = vperm.xlu2 %602, %v378_v42  }
 0x25b   : > { %412 = vperm.xlu2 %602, %v393_v48  }
 0x2ad   : > { %v408_v49 = vpop.permute.xlu2 %407 }
 0x2ae   : > { %v419_v50 = vmul.f32 %v408_v49, %v845_v2  ;;  %v420_v51 = vmul.f32 %v408_v49, %v851_v5 }
 0x2b0   : > { %427 = vst [vmem:[%s190_s22 + $0x20] sm:$0xff] %v419_v50 }
 0x2b1   : > { %428 = vst [vmem:[%s190_s22 + $0x28] sm:$0xff] %v420_v51 }
 0x2b5   : > { %v413_v52 = vpop.permute.xlu2 %412 }
 0x2b6   : > { %v421_v53 = vmul.f32 %v413_v52, %v841_v0  ;;  %v422_v54 = vmul.f32 %v413_v52, %v843_v1  ;;  %v398_v55 = vpop.permute.xlu0 %397 }
 0x2b7   : > { %v415_v56 = vmul.f32 %v398_v55, %v859_v9  ;;  %v416_v57 = vmul.f32 %v398_v55, %v861_v10 }
 0x2b8   : > { %429 = vst [vmem:[%s190_s22 + $0x30] sm:$0xff] %v421_v53 }
 0x2b9   : > { %430 = vst [vmem:[%s190_s22 + $0x38] sm:$0xff] %v422_v54 }
 0x2ba   : > { %423 = vst [vmem:[%s190_s22] sm:$0xff] %v415_v56 }
 0x2bb   : > { %424 = vst [vmem:[%s190_s22 + $0x8] sm:$0xff] %v416_v57 }
 0x2bd   : > { %v403_v0 = vpop.permute.xlu1 %402 }
 0x2be   : > { %v417_v1 = vmul.f32 %v403_v0, %v855_v7  ;;  %v418_v2 = vmul.f32 %v403_v0, %v857_v8 }
 0x2c0   : > { %425 = vst [vmem:[%s190_s22 + $0x10] sm:$0xff] %v417_v1 }
 0x2c1   : > { %426 = vst [vmem:[%s190_s22 + $0x18] sm:$0xff] %v418_v2 }
 0x2c2   : > { %678 = shalt.err (!%p675_p4)
}
 0x2c3   : > { %s723_s29 = smov 256   ;;  %s724_s17 = smov 16  }
 0x2c4   : > { %550 = dma.vmem_to_hbm [thread:$0]  (%p795_p11), %s445_s30, 1024, %s447_s16, %s432_s6, %s723_s29, %s723_s29, %s724_s17  }
 0x2c5 PF: > { %s461_s19 = sand.u32 1, %s705_s12   ;;  %p944_p7 = scmp.ge.s32.totalorder %s717_s15, 2 }
 0x2c6   : > { %s462_s20 = scalar_lea.sflag [#allocation4], %s461_s19 }
 0x2c7   : > { %p557_p5 = pnand %p944_p7, %p799_p12 }
 0x2c9   : > { %p558_p8 = pneg %p557_p5 }
 0x2cb   : > { %700 = dma.done.wait (%p558_p8), %s462_s20, 1024  }
 0x2cc   : > { %702 = vsyncadd (%p558_p8), %s462_s20, 4294966272  ;;  %p16_p10 = scmp.ge.s32.totalorder %s770_s18, 4   ;;  %s945_s12 = smov %s709_s13 }
 0x2cd   : > { %s946_s13 = smov %s713_s14  ;;  %s947_s14 = smov %s782_s21 }
 0x2ce   : > { %s948_s15 = smov %s770_s18  ;;  %18 = sbr.rel (!%p16_p10) target bundleno = 5 (0x5), region = 77 }
 0x2d3   :  { %468 = vsyncpa [#allocation3], 1 }
 0x2d4   :  { %470 = vsyncpa [#allocation3 + $0x1], 1 }
 0x2d5   :  { %471 = vsyncpa [#allocation4], 1 }
 0x2d6   :  { %473 = vsyncpa [#allocation4 + $0x1], 1 }

</bundles_post_ra>
